<compile_context>
chip_gen: v7x
topology: tpu7x:2x2x1
jax: 0.10.0
libtpu: 0.0.40
codegen_flags: <defaults>
</compile_context>

<pallas_src>
import math

import jax
import jax.numpy as jnp
from jax.experimental import pallas as pl
from jax.experimental.pallas import tpu as pltpu


def _gelu_kernel(x_ref, o_ref):
    # Upcast to f32: matches PyTorch half-precision opmath, free because the
    # kernel is HBM-bound (cast stays in registers, traffic unchanged).
    x = x_ref[...].astype(jnp.float32)
    c = jnp.float32(math.sqrt(2.0 / math.pi))
    k = jnp.float32(0.0044715)
    inner = c * (x + k * (x * x * x))
    y = 0.5 * x * (1.0 + jnp.tanh(inner))
    o_ref[...] = y.astype(o_ref.dtype)


def _ceil_to(a, m):
    return -(-a // m) * m


def _target_block_bytes():
    # Generation-gate the per-buffer block size:
    #   v6e / v7x: 4 MiB  -> 16 MiB resident (2 bufs x in+out) < 32 MiB scoped VMEM
    #   v5e / unknown: 2 MiB -> 8 MiB resident, safe under a 16 MiB scoped default
    try:
        kind = jax.devices()[0].device_kind.lower()
    except Exception:
        kind = ""
    if ("v6" in kind) or ("v7" in kind) or ("7x" in kind):
        return 4 << 20
    return 2 << 20


def gelu_pallas(x):
    orig_shape = x.shape
    n = x.size
    if n == 0:
        return x
    itemsize = jnp.dtype(x.dtype).itemsize
    # Sublane multiple for the packed dtype: 8 for f32, 16 for bf16, 32 for i8.
    sub = max(8, 32 // itemsize)

    # Lane-dense last dim: pick the largest of 1024/512/256/128 dividing n so
    # stores are unmasked full-lane vst's and no wrapper pad/copy is needed.
    lane = None
    for cand in (1024, 512, 256, 128):
        if n % cand == 0:
            lane = cand
            break
    if lane is None:
        lane = 1024 if n >= 1024 else 128

    rows = -(-n // lane)
    n_rows_elems = rows * lane

    block_bytes = _target_block_bytes()
    block_rows = max(sub, (block_bytes // (lane * itemsize)) // sub * sub)
    if rows <= block_rows:
        if rows >= 2 * sub:
            # Ensure >=2 grid steps so both v7x TensorCores get work.
            block_rows = _ceil_to(-(-rows // 2), sub)
        else:
            # Tiny problem: one full-extent block (block dim == array dim).
            block_rows = rows

    grid = (pl.cdiv(rows, block_rows),)

    x_flat = x.reshape(-1)
    if n_rows_elems != n:
        # Rare path: only for sizes not divisible by 128; pads < lane elements.
        x_flat = jnp.pad(x_flat, (0, n_rows_elems - n))
    x2d = x_flat.reshape(rows, lane)

    out = pl.pallas_call(
        _gelu_kernel,
        out_shape=jax.ShapeDtypeStruct((rows, lane), x.dtype),
        grid_spec=pltpu.PrefetchScalarGridSpec(
            num_scalar_prefetch=0,
            grid=grid,
            in_specs=[pl.BlockSpec((block_rows, lane), lambda i: (i, 0))],
            out_specs=pl.BlockSpec((block_rows, lane), lambda i: (i, 0)),
        ),
        compiler_params=pltpu.CompilerParams(
            dimension_semantics=("parallel",),
        ),
        cost_estimate=pl.CostEstimate(
            flops=8 * n_rows_elems,
            transcendentals=n_rows_elems,
            bytes_accessed=2 * n_rows_elems * itemsize,
        ),
    )(x2d)

    out_flat = out.reshape(-1)
    if n_rows_elems != n:
        out_flat = out_flat[:n]
    return out_flat.reshape(orig_shape)


def gelu_reference(x):
    # Pure-JAX reference matching the PyTorch forward exactly (f32 opmath).
    xf = x.astype(jnp.float32)
    c = math.sqrt(2.0 / math.pi)
    y = 0.5 * xf * (1.0 + jnp.tanh(c * (xf + 0.0044715 * jnp.power(xf, 3))))
    return y.astype(x.dtype)


if __name__ == "__main__":
    key = jax.random.PRNGKey(0)

    # Small LLM-ish activation: (batch=2, seq=8, hidden=128) — lane divides n,
    # no padding, single full-extent block.
    x = jax.random.normal(key, (2, 8, 128), dtype=jnp.float32)
    y = gelu_pallas(x)
    jax.block_until_ready(y)
    assert y.shape == x.shape and y.dtype == x.dtype
    assert jnp.allclose(y, gelu_reference(x), atol=1e-5, rtol=1e-5)

    # Awkward, non-128-aligned shape — exercises the (tiny) pad/unpad path.
    x2 = jax.random.normal(jax.random.PRNGKey(1), (3, 5, 7), dtype=jnp.float32)
    y2 = gelu_pallas(x2)
    jax.block_until_ready(y2)
    assert y2.shape == x2.shape
    assert jnp.allclose(y2, gelu_reference(x2), atol=1e-5, rtol=1e-5)

    # Medium shape — exercises the multi-block (>=2 grid steps) ragged path.
    x3 = jax.random.normal(jax.random.PRNGKey(2), (4, 64, 256), dtype=jnp.float32)
    y3 = gelu_pallas(x3)
    jax.block_until_ready(y3)
    assert y3.shape == x3.shape
    assert jnp.allclose(y3, gelu_reference(x3), atol=1e-5, rtol=1e-5)

    # bf16 — exercises the in-kernel f32 upcast path (PyTorch-matching opmath).
    x4 = jax.random.normal(jax.random.PRNGKey(3), (2, 16, 384)).astype(jnp.bfloat16)
    y4 = gelu_pallas(x4)
    jax.block_until_ready(y4)
    assert y4.shape == x4.shape and y4.dtype == x4.dtype
    assert jnp.allclose(
        y4.astype(jnp.float32),
        gelu_reference(x4).astype(jnp.float32),
        atol=2e-2,
        rtol=2e-2,
    )

    print("KERNEL_OK")
</pallas_src>

<mosaic_0001>
module attributes {stable_mosaic.version = 11 : i64} {
  func.func @_gelu_kernel(%arg0: i32, %arg1: memref<2x1024xf32, #tpu.memory_space<vmem>>, %arg2: memref<2x1024xf32, #tpu.memory_space<vmem>>) attributes {dimension_semantics = [#tpu.dimension_semantics<parallel>], iteration_bounds = array<i64: 1>, scalar_prefetch = 0 : i64, scratch_operands = 0 : i64, tpu.core_type = #tpu.core_type<tc>, window_params = [{transform_indices = @transform_0, window_bounds = array<i64: 2, 1024>}, {transform_indices = @transform_1, window_bounds = array<i64: 2, 1024>}]} {
    %c0 = arith.constant 0 : index
    %c0_0 = arith.constant 0 : index
    %0 = vector.load %arg1[%c0, %c0_0] : memref<2x1024xf32, #tpu.memory_space<vmem>>, vector<2x1024xf32>
    %1 = arith.mulf %0, %0 : vector<2x1024xf32>
    %2 = arith.mulf %1, %0 : vector<2x1024xf32>
    %cst = arith.constant 4.471500e-03 : f32
    %3 = vector.broadcast %cst : f32 to vector<2x1024xf32>
    %4 = arith.mulf %3, %2 : vector<2x1024xf32>
    %5 = arith.addf %0, %4 : vector<2x1024xf32>
    %cst_1 = arith.constant 0.797884583 : f32
    %6 = vector.broadcast %cst_1 : f32 to vector<2x1024xf32>
    %7 = arith.mulf %6, %5 : vector<2x1024xf32>
    %cst_2 = arith.constant 5.000000e-01 : f32
    %8 = vector.broadcast %cst_2 : f32 to vector<2x1024xf32>
    %9 = arith.mulf %8, %0 : vector<2x1024xf32>
    %10 = math.tanh %7 : vector<2x1024xf32>
    %cst_3 = arith.constant 1.000000e+00 : f32
    %11 = vector.broadcast %cst_3 : f32 to vector<2x1024xf32>
    %12 = arith.addf %11, %10 : vector<2x1024xf32>
    %13 = arith.mulf %9, %12 : vector<2x1024xf32>
    %c0_4 = arith.constant 0 : index
    %c0_5 = arith.constant 0 : index
    %14 = vector.load %arg2[%c0_4, %c0_5] : memref<2x1024xf32, #tpu.memory_space<vmem>>, vector<2x1024xf32>
    tpu.vector_store %arg2[%c0_4, %c0_5], %13 {strides = array<i32>} : memref<2x1024xf32, #tpu.memory_space<vmem>>, vector<2x1024xf32>,
    return
  }
  func.func @transform_0(%arg0: i32) -> (i32, i32) {
    %c0_i32 = arith.constant 0 : i32
    %c0_i32_0 = arith.constant 0 : i32
    return %arg0, %c0_i32 : i32, i32
  }
  func.func @transform_1(%arg0: i32) -> (i32, i32) {
    %c0_i32 = arith.constant 0 : i32
    %c0_i32_0 = arith.constant 0 : i32
    return %arg0, %c0_i32 : i32, i32
  }
}

</mosaic_0001>

<bundles_post_ra>
// kernel: tpu_custom_call.1
= control target key start
LH: loop header
LB: loop body
LE: loop exit
PB: predicated region body
PF: predicated region fallthrough
CT: control target
= control target key end

     0   :  { %6 = vsyncpa [#allocation3], 0  ;;  %s148_s0 = inlined_call_operand.hbm [shape: f32[2,1024], index: 0, kind: input, shape index: {}]   ;;  %s149_s1 = inlined_call_operand.hbm [shape: f32[2,1024], index: 1, kind: output, shape index: {}]  }
   0x1   :  { %7 = vsyncpa [#allocation4], 0  ;;  %s112_s6 = smov [#allocation2]   ;;  %s64_s10 = scalar_lea.hbm %s148_s0, 256 }
   0x2   :  { %s14_s7 = sshll.u32 %s112_s6, 4  ;;  %p65_p0 = scmp.ne.s32.totalorder %s148_s0, %s64_s10  ;;  %s15_s7 = int_to_ptr.vmem [resolvable:$true] %s14_s7 }
   0x3   :  { %p68_p1 = scmp.lt.u32.totalorder %s64_s10, %s148_s0 }
   0x5   :  { %p70_p2 = pnand %p68_p1, %p65_p0 }
   0x7   :  { %73 = shalt.err (!%p70_p2)
}
   0x8   :  { %s74_s15 = scalar_lea.vmem %s15_s7, 256  ;;  %p79_p4 = scmp.lt.s32.totalorder %s15_s7, %s15_s7 }
   0x9   :  { %p75_p3 = scmp.ne.s32.totalorder %s15_s7, %s74_s15  ;;  %p80_p5 = scmp.lt.s32.totalorder %s74_s15, %s74_s15 }
   0xb   :  { %p81_p6 = por %p80_p5, %p79_p4 }
   0xd   :  { %p82_p7 = pnand %p81_p6, %p75_p3 }
   0xf   :  { %85 = shalt.err (!%p82_p7)
}
  0x10   :  { %17 = dma.hbm_to_vmem [thread:$0]  %s148_s0, 256, %s15_s7, [#allocation3]  }
  0x11   :  { %108 = dma.done.wait [#allocation3], 256  }
  0x12   :  { %109 = vsyncadd [#allocation3], 4294967040  ;;  %v21_v0 = vld [vmem:[#allocation2] sm:$0xff]  ;;  %v22_v1 = vld [vmem:[#allocation2 + $0x8] sm:$0xff]  ;;  %s113_s0 = smov [#allocation5]  }
  0x13   :  { %v23_v2 = vmul.f32 %v21_v0, %v21_v0  ;;  %v24_v3 = vmul.f32 %v22_v1, %v22_v1  ;;  %v33_v12 = vmul.f32 0.5, %v21_v0  ;;  %v34_v14 = vmul.f32 0.5, %v22_v1  ;;  %s49_s18 = sshll.u32 %s113_s0, 4  ;;  %s50_s18 = int_to_ptr.vmem [resolvable:$true] %s49_s18 }
  0x14   :  { %s86_s19 = scalar_lea.vmem %s50_s18, 256  ;;  %p91_p9 = scmp.lt.s32.totalorder %s50_s18, %s50_s18 }
  0x15   :  { %v25_v4 = vmul.f32 %v23_v2, %v21_v0  ;;  %v26_v5 = vmul.f32 %v24_v3, %v22_v1  ;;  %p87_p8 = scmp.ne.s32.totalorder %s50_s18, %s86_s19  ;;  %p92_p10 = scmp.lt.s32.totalorder %s86_s19, %s86_s19 }
  0x17   :  { %v27_v6 = vmul.f32 0.0044715, %v25_v4  ;;  %v28_v7 = vmul.f32 0.0044715, %v26_v5  ;;  %p93_p11 = por %p92_p10, %p91_p9 }
  0x19   :  { %v29_v8 = vadd.f32 %v27_v6, %v21_v0  ;;  %v30_v9 = vadd.f32 %v28_v7, %v22_v1  ;;  %p94_p12 = pnand %p93_p11, %p87_p8 }
  0x1b   :  { %v31_v10 = vmul.f32 0.7978846, %v29_v8  ;;  %v32_v11 = vmul.f32 0.7978846, %v30_v9 }
  0x1d   :  { %60 = vtanh.f32 %v31_v10 }
  0x1e   :  { %62 = vtanh.f32 %v32_v11 }
  0x27   :  { %v61_v13 = vpop.eup %60 }
  0x28   :  { %v63_v15 = vpop.eup %62  ;;  %v37_v16 = vadd.f32 1.0, %v61_v13 }
  0x29   :  { %v38_v17 = vadd.f32 1.0, %v63_v15 }
  0x2a   :  { %v39_v18 = vmul.f32 %v37_v16, %v33_v12 }
  0x2b   :  { %v40_v19 = vmul.f32 %v38_v17, %v34_v14 }
  0x2c   :  { %41 = vst [vmem:[#allocation5] sm:$0xff] %v39_v18 }
  0x2d   :  { %42 = vst [vmem:[#allocation5 + $0x8] sm:$0xff] %v40_v19 }
  0x2e   :  { %97 = shalt.err (!%p94_p12)
}
  0x2f   :  { %s98_s22 = scalar_lea.hbm %s149_s1, 256 }
  0x30   :  { %p99_p13 = scmp.ne.s32.totalorder %s149_s1, %s98_s22  ;;  %p102_p0 = scmp.lt.u32.totalorder %s98_s22, %s149_s1 }
  0x32   :  { %p104_p1 = pnand %p102_p0, %p99_p13 }
  0x34   :  { %107 = shalt.err (!%p104_p1)
}
  0x35   :  { %52 = dma.vmem_to_hbm [thread:$0]  %s50_s18, 256, %s149_s1, [#allocation4]  }
  0x36   :  { %110 = dma.done.wait [#allocation4], 256  }
  0x37   :  { %111 = vsyncadd [#allocation4], 4294967040 }
  0x38   :  { %56 = vsyncpa [#allocation3], 1 }
  0x39   :  { %57 = vsyncpa [#allocation4], 1 }

</bundles_post_ra>
